<compile_context>
chip_gen: v7x
topology: tpu7x:2x2x1
jax: 0.10.0
libtpu: 0.0.40
codegen_flags: <defaults>
</compile_context>

<pallas_src>
import jax
import jax.numpy as jnp
from jax import lax
from jax.experimental import pallas as pl
from jax.experimental.pallas import tpu as pltpu


def simple_nn_kernel(x_ref, w1_ref, b1_ref, w2c_ref, b2_ref, o_ref):
    # x:   (tb, 10)  natural batch-major tile (caller dtype)
    # w1:  (5, 10)   resident, caller dtype (torch Linear layout: out x in)
    # b1:  (5, 1)    resident f32, lane-broadcast
    # w2c: (5, 1)    fc2 weight as a column, resident f32
    # b2:  (1, 1)    resident f32
    # o:   (1, tb)   lane-dense store (caller dtype)
    #
    # fc1 as an NT matmul: contract the feature axis of both operands so the
    # MXU emits the result already batch-on-lanes -- no explicit transpose.
    h = lax.dot_general(
        w1_ref[...], x_ref[...],
        dimension_numbers=(((1,), (1,)), ((), ())),
        preferred_element_type=jnp.float32,
    )                                                                 # (5, tb) f32
    h = jnp.maximum(h + b1_ref[...], 0.0)                             # bias + ReLU
    # fc2 (5 -> 1) as VPU broadcast-multiply + sublane (XLU) reduction; a
    # degenerate MXU matmul buys nothing here (kernel is HBM-bound anyway).
    z = jnp.sum(h * w2c_ref[...], axis=0, keepdims=True) + b2_ref[...]  # (1, tb)
    o_ref[...] = jax.nn.sigmoid(z).astype(o_ref.dtype)


def simple_nn_forward(x, w1, b1, w2, b2, *, tb_max=16384):
    """x: (B, 10); w1: (5, 10) [torch layout], b1: (5,); w2: (1, 5), b2: (1,)."""
    B, F = x.shape
    assert F == 10, "SimpleNN expects 10 input features"

    # --- batch tile selection ------------------------------------------------
    # The x window in VMEM is lane-padded ((tb,10) -> tb*128 elems), so the
    # double-buffered footprint is 2*tb*128*itemsize; tb_max=16384 keeps that
    # at 16 MiB for f32 while giving ~640 KiB per-step DMAs (well above the
    # ~0.35us per-grid-step overhead on all generations).
    if B <= 128:
        tb = B                                     # single full-dim block: always legal
    else:
        tb_cap = max(128, (tb_max // 128) * 128)   # force a multiple of 128
        tb_two = pl.cdiv(B, 2 * 128) * 128         # tile giving >=2 blocks (v7x: 2 TCs)
        tb = max(128, min(tb_cap, tb_two))
    num_blocks = pl.cdiv(B, tb)

    w1c = w1.astype(x.dtype)                       # fc1 dot runs in the caller dtype
    b1c = b1.reshape(5, 1).astype(jnp.float32)
    w2c = jnp.transpose(w2).astype(jnp.float32)    # (5, 1)
    b2c = b2.reshape(1, 1).astype(jnp.float32)

    out_row = pl.pallas_call(
        simple_nn_kernel,
        out_shape=jax.ShapeDtypeStruct((1, B), x.dtype),
        grid=(num_blocks,),
        in_specs=[
            pl.BlockSpec((tb, 10), lambda i: (i, 0)),   # natural x tile; tail clip-read
            pl.BlockSpec((5, 10), lambda i: (0, 0)),    # w1 resident
            pl.BlockSpec((5, 1), lambda i: (0, 0)),     # b1 resident
            pl.BlockSpec((5, 1), lambda i: (0, 0)),     # w2 column resident
            pl.BlockSpec((1, 1), lambda i: (0, 0)),     # b2 resident
        ],
        out_specs=pl.BlockSpec((1, tb), lambda i: (0, i)),  # lane-dense out tile; tail clip-write
        compiler_params=pltpu.CompilerParams(
            dimension_semantics=("parallel",),
            vmem_limit_bytes=48 * 1024 * 1024,
        ),
    )(x, w1c, b1c, w2c, b2c)

    # (1, B) -> (B, 1): layout-trivial for XLA (a leading dim of 1), unlike
    # transposing the (B, 10) input was.
    return jnp.transpose(out_row)


def init_params(key):
    """Deterministic init matching torch nn.Linear shapes (Kaiming-uniform-ish)."""
    k1, k2, k3, k4 = jax.random.split(key, 4)
    bound1 = 1.0 / jnp.sqrt(10.0)
    bound2 = 1.0 / jnp.sqrt(5.0)
    w1 = jax.random.uniform(k1, (5, 10), jnp.float32, -bound1, bound1)
    b1 = jax.random.uniform(k2, (5,), jnp.float32, -bound1, bound1)
    w2 = jax.random.uniform(k3, (1, 5), jnp.float32, -bound2, bound2)
    b2 = jax.random.uniform(k4, (1,), jnp.float32, -bound2, bound2)
    return w1, b1, w2, b2


def _reference(x, w1, b1, w2, b2):
    h = jnp.maximum(x @ w1.T + b1, 0.0)
    return jax.nn.sigmoid(h @ w2.T + b2)


if __name__ == "__main__":
    key = jax.random.PRNGKey(0)
    k_x, k_p, k_x2 = jax.random.split(key, 3)

    w1, b1, w2, b2 = init_params(k_p)

    # Small batch (single full-dim block, no alignment constraints).
    batch = 8
    x = jax.random.normal(k_x, (batch, 10), jnp.float32)
    out = jax.block_until_ready(simple_nn_forward(x, w1, b1, w2, b2))
    ref = _reference(x, w1, b1, w2, b2)
    assert out.shape == (batch, 1)
    assert jnp.allclose(out, ref, atol=1e-5, rtol=1e-5)

    # Ragged batch exercising multiple grid steps + clip-read/clip-write tail.
    batch2 = 1000
    x2 = jax.random.normal(k_x2, (batch2, 10), jnp.float32)
    out2 = jax.block_until_ready(simple_nn_forward(x2, w1, b1, w2, b2, tb_max=256))
    ref2 = _reference(x2, w1, b1, w2, b2)
    assert out2.shape == (batch2, 1)
    assert jnp.allclose(out2, ref2, atol=1e-5, rtol=1e-5)

    print("KERNEL_OK")
</pallas_src>

<mosaic_0001>
module attributes {stable_mosaic.version = 11 : i64} {
  func.func @simple_nn_kernel(%arg0: i32, %arg1: memref<8x10xf32, #tpu.memory_space<vmem>>, %arg2: memref<5x10xf32, #tpu.memory_space<vmem>>, %arg3: memref<5x1xf32, #tpu.memory_space<vmem>>, %arg4: memref<5x1xf32, #tpu.memory_space<vmem>>, %arg5: memref<1x1xf32, #tpu.memory_space<vmem>>, %arg6: memref<1x8xf32, #tpu.memory_space<vmem>>) attributes {dimension_semantics = [#tpu.dimension_semantics<parallel>], iteration_bounds = array<i64: 1>, scalar_prefetch = 0 : i64, scratch_operands = 0 : i64, tpu.core_type = #tpu.core_type<tc>, window_params = [{transform_indices = @transform_0, window_bounds = array<i64: 8, 10>}, {pipeline_mode = #tpu.pipeline_mode<synchronous>, transform_indices = @transform_1, window_bounds = array<i64: 5, 10>}, {pipeline_mode = #tpu.pipeline_mode<synchronous>, transform_indices = @transform_2, window_bounds = array<i64: 5, 1>}, {pipeline_mode = #tpu.pipeline_mode<synchronous>, transform_indices = @transform_3, window_bounds = array<i64: 5, 1>}, {pipeline_mode = #tpu.pipeline_mode<synchronous>, transform_indices = @transform_4, window_bounds = array<i64: 1, 1>}, {transform_indices = @transform_5, window_bounds = array<i64: 1, 8>}]} {
    %c0 = arith.constant 0 : index
    %c0_0 = arith.constant 0 : index
    %0 = vector.load %arg2[%c0, %c0_0] : memref<5x10xf32, #tpu.memory_space<vmem>>, vector<5x10xf32>
    %c0_1 = arith.constant 0 : index
    %c0_2 = arith.constant 0 : index
    %1 = vector.load %arg1[%c0_1, %c0_2] : memref<8x10xf32, #tpu.memory_space<vmem>>, vector<8x10xf32>
    %cst = arith.constant dense<0.000000e+00> : vector<5x8xf32>
    %2 = tpu.matmul %0, %1, %cst {dimension_numbers = #tpu.dot_dimension_numbers<[1], [1], [0], [0], [0, 0, 1, 0], [], []>} : vector<5x10xf32>, vector<8x10xf32>, vector<5x8xf32> -> vector<5x8xf32>
    %c0_3 = arith.constant 0 : index
    %c0_4 = arith.constant 0 : index
    %3 = vector.load %arg3[%c0_3, %c0_4] : memref<5x1xf32, #tpu.memory_space<vmem>>, vector<5x1xf32>
    %4 = vector.broadcast %3 : vector<5x1xf32> to vector<5x8xf32>
    %5 = arith.addf %2, %4 : vector<5x8xf32>
    %cst_5 = arith.constant 0.000000e+00 : f32
    %6 = vector.broadcast %cst_5 : f32 to vector<5x8xf32>
    %7 = arith.maximumf %5, %6 : vector<5x8xf32>
    %c0_6 = arith.constant 0 : index
    %c0_7 = arith.constant 0 : index
    %8 = vector.load %arg4[%c0_6, %c0_7] : memref<5x1xf32, #tpu.memory_space<vmem>>, vector<5x1xf32>
    %9 = vector.broadcast %8 : vector<5x1xf32> to vector<5x8xf32>
    %10 = arith.mulf %7, %9 : vector<5x8xf32>
    %cst_8 = arith.constant dense<0.000000e+00> : vector<8xf32>
    %11 = vector.multi_reduction <add>, %10, %cst_8 [0] : vector<5x8xf32> to vector<8xf32>
    %12 = vector.shape_cast %11 : vector<8xf32> to vector<1x8xf32>
    %c0_9 = arith.constant 0 : index
    %c0_10 = arith.constant 0 : index
    %13 = vector.load %arg5[%c0_9, %c0_10] : memref<1x1xf32, #tpu.memory_space<vmem>>, vector<1x1xf32>
    %14 = vector.broadcast %13 : vector<1x1xf32> to vector<1x8xf32>
    %15 = arith.addf %12, %14 : vector<1x8xf32>
    %16 = arith.negf %15 : vector<1x8xf32>
    %17 = math.exp %16 : vector<1x8xf32>
    %cst_11 = arith.constant 1.000000e+00 : f32
    %18 = vector.broadcast %cst_11 : f32 to vector<1x8xf32>
    %19 = arith.addf %18, %17 : vector<1x8xf32>
    %20 = arith.divf %18, %19 : vector<1x8xf32>
    %c0_12 = arith.constant 0 : index
    %c0_13 = arith.constant 0 : index
    %21 = vector.load %arg6[%c0_12, %c0_13] : memref<1x8xf32, #tpu.memory_space<vmem>>, vector<1x8xf32>
    tpu.vector_store %arg6[%c0_12, %c0_13], %20 {strides = array<i32>} : memref<1x8xf32, #tpu.memory_space<vmem>>, vector<1x8xf32>,
    return
  }
  func.func @transform_0(%arg0: i32) -> (i32, i32) {
    %c0_i32 = arith.constant 0 : i32
    %c0_i32_0 = arith.constant 0 : i32
    return %arg0, %c0_i32 : i32, i32
  }
  func.func @transform_1(%arg0: i32) -> (i32, i32) {
    %c0_i32 = arith.constant 0 : i32
    %c0_i32_0 = arith.constant 0 : i32
    %c0_i32_1 = arith.constant 0 : i32
    return %c0_i32, %c0_i32_0 : i32, i32
  }
  func.func @transform_2(%arg0: i32) -> (i32, i32) {
    %c0_i32 = arith.constant 0 : i32
    %c0_i32_0 = arith.constant 0 : i32
    %c0_i32_1 = arith.constant 0 : i32
    return %c0_i32, %c0_i32_0 : i32, i32
  }
  func.func @transform_3(%arg0: i32) -> (i32, i32) {
    %c0_i32 = arith.constant 0 : i32
    %c0_i32_0 = arith.constant 0 : i32
    %c0_i32_1 = arith.constant 0 : i32
    return %c0_i32, %c0_i32_0 : i32, i32
  }
  func.func @transform_4(%arg0: i32) -> (i32, i32) {
    %c0_i32 = arith.constant 0 : i32
    %c0_i32_0 = arith.constant 0 : i32
    %c0_i32_1 = arith.constant 0 : i32
    return %c0_i32, %c0_i32_0 : i32, i32
  }
  func.func @transform_5(%arg0: i32) -> (i32, i32) {
    %c0_i32 = arith.constant 0 : i32
    %c0_i32_0 = arith.constant 0 : i32
    return %c0_i32, %arg0 : i32, i32
  }
}

</mosaic_0001>

<bundles_post_ra>
// kernel: tpu_custom_call.1
= control target key start
LH: loop header
LB: loop body
LE: loop exit
PB: predicated region body
PF: predicated region fallthrough
CT: control target
= control target key end

     0   :  { %s264_s0 = inlined_call_operand.vmem [shape: f32[8,10], index: 0, kind: input, shape index: {}]   ;;  %s265_s1 = inlined_call_operand.vmem [shape: f32[5,10], index: 1, kind: input, shape index: {}]   ;;  %s266_s2 = inlined_call_operand.vmem [shape: f32[5,1], index: 2, kind: input, shape index: {}]   ;;  %s267_s3 = inlined_call_operand.vmem [shape: f32[5,1], index: 3, kind: input, shape index: {}]   ;;  %s268_s4 = inlined_call_operand.<no memory space> [shape: f32[1,1], index: 4, kind: input, shape index: {}]   ;;  %s269_s5 = inlined_call_operand.hbm [shape: f32[1,8], index: 5, kind: output, shape index: {}]  }
   0x1   :  { %v10_v0 = vstv %s268_s4 }
   0x2   :  { %11 = vst [vmem:[#allocation2] sm:$0x1] %v10_v0 }
   0x3   :  { %v24_v1 = vld [vmem:[%s264_s0] sm:$0xff]  ;;  %vm31_vm0 = vcmask 80896   ;;  %v201_v2 = vmov 0.0   ;;  %vm202_vm1 = vmmov 0   ;;  %v203_v5 = vmov 0  }
   0x4   :  { %162 = vmatprep.subr.mxu0 %v201_v2  ;;  %164 = vmatprep.mubr.msk.f32.mxu0 %vm202_vm1, %v201_v2  ;;  %v25_v3 = vld [vmem:[%s266_s2] sm:$0x1f] }
   0x5   :  { %163 = vmatpush3.xpose.msk.msra.mxu0 %vm31_vm0, %v24_v1  ;;  %v23_v4 = vld [vmem:[%s265_s1] sm:$0x1f]  ;;  %171 = vset.pattern.permute.xlu0 %v203_v5 }
   0x9   :  { %v124_v6 = vld [vmem:[#allocation2] sm:$0x1] }
   0xa   :  { %12 = vsyncpa [#allocation4], 0  ;;  %28 = vperm.xlu0 %171, %v25_v3   ;;  %172 = vset.pattern.permute.xlu1 %v203_v5  ;;  %v109_v7 = vld [vmem:[%s267_s3] sm:$0x1f]  ;;  %vm116_vm2 = vcmask 61440   ;;  %v130_v14 = vlaneseq  ;;  %s204_s1 = smov [#allocation3]  }
   0xb   :  { %127 = vperm.xlu1 %172, %v124_v6   ;;  %165 = vmatmul.mubr.msk.f32.vlgmr.msra.gmra.mrb[0].mxu0 %vm31_vm0, %v23_v4  ;;  %s149_s2 = sshll.u32 %s204_s1, 4  ;;  %vm141_vm3 = vcmask 57344   ;;  %s150_s2 = int_to_ptr.vmem [resolvable:$true] %s149_s2 }
   0xc   :  { %v131_v18 = vshrl.u32 %v130_v14, 7  ;;  %s177_s3 = scalar_lea.vmem %s150_s2, 16  ;;  %s181_s26 = scalar_lea.vmem %s150_s2, 32 }
   0xd   :  { %p178_p0 = scmp.ne.s32.totalorder %s150_s2, %s177_s3  ;;  %p182_p1 = scmp.lt.s32.totalorder %s150_s2, %s150_s2 }
   0xe   :  { %112 = vperm.xlu0 %171, %v109_v7   ;;  %v132_v21 = vsub.s32 0, %v131_v18  ;;  %p183_p2 = scmp.lt.s32.totalorder %s181_s26, %s177_s3 }
  0x10   :  { %p184_p3 = por %p183_p2, %p182_p1 }
  0x12   :  { %p185_p4 = pnand %p184_p3, %p178_p0 }
  0x89   :  { %v29_v8 = vpop.permute.xlu0 %28 }
  0x8a   :  { %v128_v22 = vpop.permute.xlu1 %127 }
  0x8b   :  { %v133_v25 = vrot.slane %v128_v22, %v132_v21 }
  0x8d   :  { %v113_v13 = vpop.permute.xlu0 %112 }
  0xde   :  { %v104_v9 = vpop.f32.mrb[0].mxu0 }
  0xdf   :  { %v105_v10 = vadd.f32 %v104_v9, %v29_v8  ;;  %v166_v11 = vpop.f32.mrb[1].mxu0 }
  0xe1   :  { %v108_v12 = vmax.f32 %v105_v10, 0.0 }
  0xe3   :  { %v115_v15 = vmul.f32 %v113_v13, %v108_v12 }
  0xe5   :  { %v117_v16 = vsel %vm116_vm2, %v115_v15, 0.0 }
  0xe6   :  { %v118_v17 = vrot.slane %v117_v16, 4 }
  0xe8   :  { %v119_v19 = vadd.f32 %v118_v17, %v117_v16 }
  0xea   :  { %v120_v20 = vrot.slane %v119_v19, 2 }
  0xec   :  { %v121_v23 = vadd.f32 %v120_v20, %v119_v19 }
  0xee   :  { %v122_v24 = vrot.slane %v121_v23, 1 }
  0xf0   :  { %v123_v26 = vadd.f32 %v122_v24, %v121_v23 }
  0xf2   :  { %v134_v27 = vadd.f32 %v133_v25, %v123_v26 }
  0xf4   :  { %v159_v28 = vmul.f32 -1.442695, %v134_v27 }
  0xf6   :  { %173 = vpow2.f32 %v159_v28 }
 0x100   :  { %v174_v29 = vpop.eup %173 }
 0x101   :  { %v138_v30 = vadd.f32 1.0, %v174_v29 }
 0x103   :  { %175 = vrcp.f32 %v138_v30 }
 0x10d   :  { %v176_v31 = vpop.eup %175 }
 0x10e   :  { %142 = vst.msk [vmem:[#allocation3] sm:$0x1] %vm141_vm3, %v176_v31 }
 0x10f   :  { %188 = shalt.err (!%p185_p4)
}
 0x110   :  { %s189_s29 = scalar_lea.hbm %s269_s5, 16 }
 0x111   :  { %p190_p5 = scmp.ne.s32.totalorder %s269_s5, %s189_s29  ;;  %p193_p6 = scmp.lt.u32.totalorder %s189_s29, %s269_s5 }
 0x113   :  { %p195_p7 = pnand %p193_p6, %p190_p5 }
 0x115   :  { %198 = shalt.err (!%p195_p7)
}
 0x116   :  { %152 = dma.vmem_to_hbm [thread:$0]  %s150_s2, 16, %s269_s5, [#allocation4]  }
 0x117   :  { %199 = dma.done.wait [#allocation4], 16  }
 0x118   :  { %200 = vsyncadd [#allocation4], 4294967280 }
 0x119   :  { %156 = vsyncpa [#allocation4], 1 }

</bundles_post_ra>
